<compile_context>
chip_gen: v5e
topology: v5e:2x2
jax: 0.10.0
libtpu: 0.0.40
codegen_flags: <defaults>
</compile_context>

<pallas_src>
import math

import numpy as np
import jax
import jax.numpy as jnp
from jax.experimental import pallas as pl
from jax.experimental.pallas import tpu as pltpu


# ----------------------------------------------------------------------------
# Host-side circuit construction (parameter setup, plain numpy)
# ----------------------------------------------------------------------------
def _rot_matrix(phi, theta, omega):
    """PennyLane Rot(phi, theta, omega) = RZ(omega) RY(theta) RZ(phi)."""
    c, s = np.cos(theta / 2.0), np.sin(theta / 2.0)
    return np.array(
        [
            [np.exp(-0.5j * (phi + omega)) * c, -np.exp(0.5j * (phi - omega)) * s],
            [np.exp(0.5j * (phi - omega)) * s, np.exp(0.5j * (phi + omega)) * c],
        ],
        dtype=np.complex128,
    )


def _single_qubit_full(gate2x2, wire, n_wires):
    """Embed a 2x2 gate on `wire` into the full 2**n space (wire 0 = MSB)."""
    full = np.array([[1.0 + 0.0j]])
    for w in range(n_wires):
        m = gate2x2 if w == wire else np.eye(2, dtype=np.complex128)
        full = np.kron(full, m)
    return full


def _cnot_full(control, target, n_wires):
    """Full-space CNOT permutation matrix (wire 0 = MSB, PennyLane convention)."""
    N = 2 ** n_wires
    P = np.zeros((N, N), dtype=np.complex128)
    for b in range(N):
        if (b >> (n_wires - 1 - control)) & 1:
            nb = b ^ (1 << (n_wires - 1 - target))
        else:
            nb = b
        P[nb, b] = 1.0
    return P


def strongly_entangling_unitary(weights, n_wires):
    """Compose StronglyEntanglingLayers(weights) into one dense unitary.

    weights: (qdepth, n_wires, 3) Rot angles (already mapped by qw_map.tanh).
    Per layer l: Rot on every wire, then CNOT(i, (i + r_l) % n) for i = 0..n-1
    with r_l = (l % (n_wires - 1)) + 1 (PennyLane default ranges).
    """
    N = 2 ** n_wires
    U = np.eye(N, dtype=np.complex128)
    n_layers = weights.shape[0]
    for layer in range(n_layers):
        for w in range(n_wires):
            phi, theta, omega = weights[layer, w]
            U = _single_qubit_full(_rot_matrix(phi, theta, omega), w, n_wires) @ U
        if n_wires > 1:
            r = (layer % (n_wires - 1)) + 1
            for w in range(n_wires):
                U = _cnot_full(w, (w + r) % n_wires, n_wires) @ U
    return U


def build_fused_unitary_rhs(mapped_weights, n_wires, pixels):
    """Host prep: U -> bf16 [Ur^T * sqrt(pixels) | Ui^T * sqrt(pixels)]  (N, 2N)."""
    U = strongly_entangling_unitary(mapped_weights, n_wires)
    scale = math.sqrt(float(pixels))          # folds the `* pixels` post-scale
    ur_t = np.real(U).T * scale
    ui_t = np.imag(U).T * scale
    u_cat = np.concatenate([ur_t, ui_t], axis=1)        # (N, 2N)
    return jnp.asarray(u_cat, dtype=jnp.bfloat16)


# ----------------------------------------------------------------------------
# Pallas kernel: fused complex matmul -> probs -> deferred normalize -> clip
# ----------------------------------------------------------------------------
def _make_qdense_kernel(n_state, eps=1e-12):
    def kernel(x_ref, u_ref, o_ref):
        x = x_ref[...]                                            # (TB, N) f32
        # Norm of the (padded) amplitude vector; XLU reduce, hides under the MXU.
        nrm2 = jnp.sum(x * x, axis=-1, keepdims=True)
        # Single fused MXU pass: y = x @ [Ur^T | Ui^T] * sqrt(pixels) -> (TB, 2N).
        y = jnp.dot(
            x.astype(jnp.bfloat16), u_ref[...],
            preferred_element_type=jnp.float32,
        )
        yr = y[:, :n_state]
        yi = y[:, n_state:]
        probs = yr * yr + yi * yi
        # Deferred L2 normalization: |U x/||x|| |^2 = |U x|^2 / ||x||^2
        # (eps guards the all-zero-row case).  EUP reciprocal, approx is fine.
        inv = pl.reciprocal(nrm2 + eps, approx=True)
        o_ref[...] = jnp.clip(probs * inv, 0.0, 1.0)

    return kernel


def _round_up(n, m):
    return ((n + m - 1) // m) * m


def qdense_undirected_forward(x_nchw, u_cat, width, height):
    """Quantum 'dense' net forward.  x_nchw: (B, 1, W, H) -> (B, 1, W, H)."""
    B = x_nchw.shape[0]
    pixels = width * height
    wires = math.ceil(math.log2(pixels))
    N = 2 ** wires
    assert u_cat.shape == (N, 2 * N)

    # 'b 1 w h -> b (w h)'
    feats = x_nchw.reshape(B, pixels).astype(jnp.float32)
    # AmplitudeEmbedding pad_with=0.1 up to 2**wires (skipped when pixels == N).
    if N > pixels:
        feats = jnp.pad(feats, ((0, 0), (0, N - pixels)), constant_values=0.1)

    # Pad the batch up to a multiple of 8 sublanes (full vreg rows, no masked
    # stores); pick a batch tile and grid over it ("parallel" -> both v7x TCs
    # once the batch is non-trivial).
    tb = min(_round_up(B, 8), 256)
    B_pad = _round_up(B, tb)
    if B_pad > B:
        feats = jnp.pad(feats, ((0, B_pad - B), (0, 0)))

    kernel = _make_qdense_kernel(N)
    probs = pl.pallas_call(
        kernel,
        out_shape=jax.ShapeDtypeStruct((B_pad, N), jnp.float32),
        grid=(B_pad // tb,),
        in_specs=[
            pl.BlockSpec((tb, N), lambda i: (i, 0)),
            pl.BlockSpec((N, 2 * N), lambda i: (0, 0)),   # unitary stays resident
        ],
        out_specs=pl.BlockSpec((tb, N), lambda i: (i, 0)),
        compiler_params=pltpu.CompilerParams(
            dimension_semantics=("parallel",),
        ),
    )(feats, u_cat)

    if B_pad > B or N > pixels:
        probs = probs[:B, :pixels]
    # 'b (w h) -> b 1 w h'
    return probs.reshape(B, 1, width, height)


# ----------------------------------------------------------------------------
# Diffusion training-step forward (undirected, prediction_goal='data')
# ----------------------------------------------------------------------------
def _add_linear_noise(x_flat, tau, decay_mod, key):
    """Deterministic stand-in for the external `noise_f`: progressively blend the
    clean image with uniform noise over `tau` steps; returns '(batch tau) pixels'
    with tau inner (batch-major), matching the einops rearrange in the module."""
    B, pixels = x_flat.shape
    noise = jax.random.uniform(key, (B, pixels), dtype=jnp.float32)
    t = jnp.arange(tau, dtype=jnp.float32) / float(max(tau - 1, 1))
    alpha = t ** (1.0 / float(decay_mod))                     # (tau,)
    seq = ((1.0 - alpha)[None, :, None] * x_flat[:, None, :]
           + alpha[None, :, None] * noise[:, None, :])        # (B, tau, pixels)
    return seq.reshape(B * tau, pixels)


def diffusion_training_forward(x_nchw, u_cat, width, height, T, noise_key):
    """Mirrors Diffusion.run_training_step_data (undirected, data prediction):
    noise schedule -> (noisy, clean) pairs -> net forward (Pallas kernel) ->
    MSELoss(reduction='none') -> mean -> abs.
    Returns (loss_mean, batches_reconstructed)."""
    B = x_nchw.shape[0]
    pixels = width * height
    x_flat = x_nchw.reshape(B, pixels).astype(jnp.float32)

    whole_noisy = _add_linear_noise(x_flat, tau=T + 1, decay_mod=3.0, key=noise_key)
    whole_noisy = whole_noisy.reshape(B, T + 1, pixels)
    batches_noisy = whole_noisy[:, 1:, :].reshape(B * T, 1, width, height)
    batches_clean = whole_noisy[:, :-1, :].reshape(B * T, 1, width, height)

    recon = qdense_undirected_forward(batches_noisy, u_cat, width, height)

    batch_loss = (recon - batches_clean) ** 2          # MSELoss(reduction='none')
    loss_mean = jnp.abs(batch_loss.mean())
    # TODO(synk): loss.backward() (the autodiff training update) has no Pallas
    # equivalent here; only the forward pass / loss value is computed.
    return loss_mean, recon


# ----------------------------------------------------------------------------
# Main: deterministic params + inputs, run once
# ----------------------------------------------------------------------------
if __name__ == "__main__":
    # Net config matches QDenseUndirected(qdepth=2, shape=16); Diffusion shape 16x16.
    qdepth = 2
    width = height = 16
    pixels = width * height                  # 256
    wires = math.ceil(math.log2(pixels))     # 8
    N = 2 ** wires                           # 256
    B = 2                                    # images
    T = 4                                    # diffusion steps -> net batch B*T = 8

    key = jax.random.PRNGKey(0)
    k_w, k_x, k_n = jax.random.split(key, 3)

    # weights ~ randn(qdepth, wires, 3) * 0.4 ; qw_map.tanh -> pi * tanh(w)
    weights = jax.random.normal(k_w, (qdepth, wires, 3), dtype=jnp.float32) * 0.4
    mapped_w = np.pi * np.tanh(np.asarray(weights, dtype=np.float64))

    # Pre-compose the circuit into one unitary, fold *pixels, fuse Re|Im, bf16.
    u_cat = build_fused_unitary_rhs(mapped_w, wires, pixels)       # (N, 2N) bf16

    # Input image batch, NCHW single channel, values in [0, 1] like image data.
    x = jax.random.uniform(k_x, (B, 1, width, height), dtype=jnp.float32)

    loss_mean, recon = diffusion_training_forward(
        x, u_cat, width, height, T=T, noise_key=k_n
    )
    loss_mean = jax.block_until_ready(loss_mean)
    recon = jax.block_until_ready(recon)

    assert recon.shape == (B * T, 1, width, height)
    assert bool(jnp.isfinite(loss_mean))
    assert bool(jnp.all(jnp.isfinite(recon)))
    assert bool(jnp.all(recon >= 0.0)) and bool(jnp.all(recon <= 1.0))
    print("KERNEL_OK")
</pallas_src>

<mosaic_0001>
module attributes {stable_mosaic.version = 11 : i64} {
  func.func @kernel(%arg0: i32, %arg1: memref<8x256xf32, #tpu.memory_space<vmem>>, %arg2: memref<256x512xbf16, #tpu.memory_space<vmem>>, %arg3: memref<8x256xf32, #tpu.memory_space<vmem>>) attributes {dimension_semantics = [#tpu.dimension_semantics<parallel>], iteration_bounds = array<i64: 1>, scalar_prefetch = 0 : i64, scratch_operands = 0 : i64, tpu.core_type = #tpu.core_type<tc>, window_params = [{transform_indices = @transform_0, window_bounds = array<i64: 8, 256>}, {pipeline_mode = #tpu.pipeline_mode<synchronous>, transform_indices = @transform_1, window_bounds = array<i64: 256, 512>}, {transform_indices = @transform_2, window_bounds = array<i64: 8, 256>}]} {
    %c0 = arith.constant 0 : index
    %c0_0 = arith.constant 0 : index
    %0 = vector.load %arg1[%c0, %c0_0] : memref<8x256xf32, #tpu.memory_space<vmem>>, vector<8x256xf32>
    %1 = arith.mulf %0, %0 : vector<8x256xf32>
    %cst = arith.constant dense<0.000000e+00> : vector<8xf32>
    %2 = vector.multi_reduction <add>, %1, %cst [1] : vector<8x256xf32> to vector<8xf32>
    %3 = vector.shape_cast %2 : vector<8xf32> to vector<8x1xf32>
    %4 = arith.truncf %0 : vector<8x256xf32> to vector<8x256xbf16>
    %c0_1 = arith.constant 0 : index
    %c0_2 = arith.constant 0 : index
    %5 = vector.load %arg2[%c0_1, %c0_2] : memref<256x512xbf16, #tpu.memory_space<vmem>>, vector<256x512xbf16>
    %cst_3 = arith.constant dense<0.000000e+00> : vector<8x512xf32>
    %6 = tpu.matmul %4, %5, %cst_3 {dimension_numbers = #tpu.dot_dimension_numbers<[1], [0], [0], [1], [0, 0, 1, 1], [], []>} : vector<8x256xbf16>, vector<256x512xbf16>, vector<8x512xf32> -> vector<8x512xf32>
    %7 = vector.extract_strided_slice %6 {offsets = [0, 0], sizes = [8, 256], strides = [1, 1]} : vector<8x512xf32> to vector<8x256xf32>
    %8 = vector.extract_strided_slice %6 {offsets = [0, 256], sizes = [8, 256], strides = [1, 1]} : vector<8x512xf32> to vector<8x256xf32>
    %9 = arith.mulf %7, %7 : vector<8x256xf32>
    %10 = arith.mulf %8, %8 : vector<8x256xf32>
    %11 = arith.addf %9, %10 : vector<8x256xf32>
    %cst_4 = arith.constant 9.99999996E-13 : f32
    %12 = vector.broadcast %cst_4 : f32 to vector<8x1xf32>
    %13 = arith.addf %3, %12 : vector<8x1xf32>
    %14 = tpu.reciprocal %13 {approx = true} : vector<8x1xf32> -> vector<8x1xf32>
    %15 = vector.broadcast %14 : vector<8x1xf32> to vector<8x256xf32>
    %16 = arith.mulf %11, %15 : vector<8x256xf32>
    %cst_5 = arith.constant 0.000000e+00 : f32
    %cst_6 = arith.constant 1.000000e+00 : f32
    %17 = vector.broadcast %cst_5 : f32 to vector<8x256xf32>
    %18 = arith.maximumf %17, %16 : vector<8x256xf32>
    %19 = vector.broadcast %cst_6 : f32 to vector<8x256xf32>
    %20 = arith.minimumf %19, %18 : vector<8x256xf32>
    %c0_7 = arith.constant 0 : index
    %c0_8 = arith.constant 0 : index
    %21 = vector.load %arg3[%c0_7, %c0_8] : memref<8x256xf32, #tpu.memory_space<vmem>>, vector<8x256xf32>
    tpu.vector_store %arg3[%c0_7, %c0_8], %20 {strides = array<i32>} : memref<8x256xf32, #tpu.memory_space<vmem>>, vector<8x256xf32>,
    return
  }
  func.func @transform_0(%arg0: i32) -> (i32, i32) {
    %c0_i32 = arith.constant 0 : i32
    %c0_i32_0 = arith.constant 0 : i32
    return %arg0, %c0_i32 : i32, i32
  }
  func.func @transform_1(%arg0: i32) -> (i32, i32) {
    %c0_i32 = arith.constant 0 : i32
    %c0_i32_0 = arith.constant 0 : i32
    %c0_i32_1 = arith.constant 0 : i32
    return %c0_i32, %c0_i32_0 : i32, i32
  }
  func.func @transform_2(%arg0: i32) -> (i32, i32) {
    %c0_i32 = arith.constant 0 : i32
    %c0_i32_0 = arith.constant 0 : i32
    return %arg0, %c0_i32 : i32, i32
  }
}

</mosaic_0001>

<bundles_post_ra>
// kernel: tpu_custom_call.1
= control target key start
LH: loop header
LB: loop body
LE: loop exit
PB: predicated region body
PF: predicated region fallthrough
CT: control target
= control target key end

     0   :  { %7 = vsyncpa [#allocation3], 0  ;;  %s1019_s0 = inlined_call_operand.hbm [shape: f32[8,256], index: 0, kind: input, shape index: {}]   ;;  %s1020_s1 = inlined_call_operand.hbm [shape: bf16[256,512], index: 1, kind: input, shape index: {}]   ;;  %s1021_s2 = inlined_call_operand.hbm [shape: f32[8,256], index: 2, kind: output, shape index: {}]  }
   0x1   :  { %8 = vsyncpa [#allocation6], 0 }
   0x2   :  { %9 = vsyncpa [#allocation4], 0  ;;  %s15_s11 = sshll.u32 %s1019_s0, 4  ;;  %s978_s12 = smov [#allocation2]   ;;  %s16_s11 = int_to_ptr.hbm [resolvable:$true] %s15_s11 }
   0x3   :  { %s17_s13 = sshll.u32 %s978_s12, 4  ;;  %s25_s16 = sshll.u32 %s1020_s1, 4  ;;  %s18_s13 = int_to_ptr.vmem [resolvable:$true] %s17_s13  ;;  %s26_s16 = int_to_ptr.hbm [resolvable:$true] %s25_s16 }
   0x4   :  { %20 = dma.hbm_to_vmem [thread:$0]  %s16_s11, 256, %s18_s13, [#allocation3]  }
   0x5   :  { %s979_s17 = smov [#allocation5]   ;;  %s980_s19 = smov 256  }
   0x6   :  { %s27_s18 = sshll.u32 %s979_s17, 4  ;;  %s981_s20 = smov 16   ;;  %s28_s18 = int_to_ptr.vmem [resolvable:$true] %s27_s18 }
   0x7   :  { %33 = dma.hbm_to_vmem [thread:$0]  %s26_s16, 8192, %s28_s18, [#allocation6], %s980_s19, %s980_s19, %s981_s20  }
   0x8   :  { %972 = dma.done.wait [#allocation3], 256  }
   0x9   :  { %973 = vsyncadd [#allocation3], 4294967040 }
   0xa   :  { %974 = dma.done.wait [#allocation6], 8192  }
   0xb   :  { %975 = vsyncadd [#allocation6], 4294959104  ;;  %v687_v0 = vld [vmem:[#allocation5 + $0xe0] sm:$0xf]  ;;  %v859_v1 = vld [vmem:[#allocation5 + $0xec] sm:$0xf0] }
   0xc   :  { %v815_v2 = vld [vmem:[#allocation5 + $0x1e0] sm:$0xf]  ;;  %v688_v3 = vor.u32 %v859_v1, %v687_v0  ;;  %v891_v4 = vld [vmem:[#allocation5 + $0x1ec] sm:$0xf0]  ;;  %v857_v5 = vld [vmem:[#allocation5 + $0xe4] sm:$0xf] }
   0xd   :  { %v689_v6 = vld [vmem:[#allocation5 + $0xf0] sm:$0xf0]  ;;  %v816_v7 = vor.u32 %v891_v4, %v815_v2  ;;  %v889_v9 = vld [vmem:[#allocation5 + $0x1e4] sm:$0xf]  ;;  %v671_v11 = vld [vmem:[#allocation5 + $0xc0] sm:$0xf] }
   0xe   :  { %v692_v8 = vor.u32 %v857_v5, %v689_v6  ;;  %v817_v10 = vld [vmem:[#allocation5 + $0x1f0] sm:$0xf0]  ;;  %435 = vmatpush.bf16.msra.mxu0 %v688_v3  ;;  %v855_v13 = vld [vmem:[#allocation5 + $0xcc] sm:$0xf0]  ;;  %v799_v14 = vld [vmem:[#allocation5 + $0x1c0] sm:$0xf] }
   0xf   :  { %v820_v12 = vor.u32 %v889_v9, %v817_v10  ;;  %v887_v15 = vld [vmem:[#allocation5 + $0x1cc] sm:$0xf0]  ;;  %448 = vmatpush.bf16.msra.mxu1 %v816_v7  ;;  %v672_v16 = vor.u32 %v855_v13, %v671_v11  ;;  %v853_v18 = vld [vmem:[#allocation5 + $0xc4] sm:$0xf]  ;;  %v673_v19 = vld [vmem:[#allocation5 + $0xd0] sm:$0xf0] }
  0x10   :  { %461 = vmatpush.bf16.msra.mxu2 %v692_v8  ;;  %v800_v17 = vor.u32 %v887_v15, %v799_v14  ;;  %v885_v20 = vld [vmem:[#allocation5 + $0x1c4] sm:$0xf]  ;;  %v676_v21 = vor.u32 %v853_v18, %v673_v19  ;;  %v801_v22 = vld [vmem:[#allocation5 + $0x1d0] sm:$0xf0]  ;;  %v655_v23 = vld [vmem:[#allocation5 + $0xa0] sm:$0xf] }
  0x11   :  { %474 = vmatpush.bf16.msra.mxu3 %v820_v12  ;;  %v851_v24 = vld [vmem:[#allocation5 + $0xac] sm:$0xf0]  ;;  %v804_v25 = vor.u32 %v885_v20, %v801_v22  ;;  %v783_v26 = vld [vmem:[#allocation5 + $0x1a0] sm:$0xf]  ;;  %v849_v28 = vld [vmem:[#allocation5 + $0xa4] sm:$0xf] }
  0x12   :  { %v883_v27 = vld [vmem:[#allocation5 + $0x1ac] sm:$0xf0]  ;;  %436 = vmatpush.bf16.msra.mxu0 %v672_v16  ;;  %v656_v29 = vor.u32 %v851_v24, %v655_v23  ;;  %v657_v30 = vld [vmem:[#allocation5 + $0xb0] sm:$0xf0]  ;;  %v881_v31 = vld [vmem:[#allocation5 + $0x1a4] sm:$0xf] }
  0x13   :  { %v785_v32 = vld [vmem:[#allocation5 + $0x1b0] sm:$0xf0]  ;;  %449 = vmatpush.bf16.msra.mxu1 %v800_v17  ;;  %v784_v33 = vor.u32 %v883_v27, %v783_v26  ;;  %v660_v34 = vor.u32 %v849_v28, %v657_v30  ;;  %v639_v35 = vld [vmem:[#allocation5 + $0x80] sm:$0xf]  ;;  %v847_v36 = vld [vmem:[#allocation5 + $0x8c] sm:$0xf0] }
  0x14   :  { %462 = vmatpush.bf16.msra.mxu2 %v676_v21  ;;  %v767_v37 = vld [vmem:[#allocation5 + $0x180] sm:$0xf]  ;;  %v788_v38 = vor.u32 %v881_v31, %v785_v32  ;;  %v879_v39 = vld [vmem:[#allocation5 + $0x18c] sm:$0xf0]  ;;  %v845_v40 = vld [vmem:[#allocation5 + $0x84] sm:$0xf]  ;;  %v640_v44 = vor.u32 %v847_v36, %v639_v35 }
  0x15   :  { %475 = vmatpush.bf16.msra.mxu3 %v804_v25  ;;  %v641_v41 = vld [vmem:[#allocation5 + $0x90] sm:$0xf0]  ;;  %v877_v42 = vld [vmem:[#allocation5 + $0x184] sm:$0xf]  ;;  %v768_v45 = vor.u32 %v879_v39, %v767_v37  ;;  %v623_v47 = vld [vmem:[#allocation5 + $0x60] sm:$0xf] }
  0x16   :  { %v769_v43 = vld [vmem:[#allocation5 + $0x190] sm:$0xf0]  ;;  %437 = vmatpush.bf16.msra.mxu0 %v656_v29  ;;  %v644_v46 = vor.u32 %v845_v40, %v641_v41  ;;  %v843_v48 = vld [vmem:[#allocation5 + $0x6c] sm:$0xf0]  ;;  %v751_v49 = vld [vmem:[#allocation5 + $0x160] sm:$0xf] }
  0x17   :  { %450 = vmatpush.bf16.msra.mxu1 %v784_v33  ;;  %v772_v50 = vor.u32 %v877_v42, %v769_v43  ;;  %v875_v51 = vld [vmem:[#allocation5 + $0x16c] sm:$0xf0]  ;;  %v841_v52 = vld [vmem:[#allocation5 + $0x64] sm:$0xf]  ;;  %v625_v53 = vld [vmem:[#allocation5 + $0x70] sm:$0xf0]  ;;  %v624_v56 = vor.u32 %v843_v48, %v623_v47 }
  0x18   :  { %463 = vmatpush.bf16.msra.mxu2 %v660_v34  ;;  %v873_v54 = vld [vmem:[#allocation5 + $0x164] sm:$0xf]  ;;  %v753_v55 = vld [vmem:[#allocation5 + $0x170] sm:$0xf0]  ;;  %v752_v57 = vor.u32 %v875_v51, %v751_v49  ;;  %v628_v58 = vor.u32 %v841_v52, %v625_v53  ;;  %v607_v59 = vld [vmem:[#allocation5 + $0x40] sm:$0xf] }
  0x19   :  { %476 = vmatpush.bf16.msra.mxu3 %v788_v38  ;;  %v839_v60 = vld [vmem:[#allocation5 + $0x4c] sm:$0xf0]  ;;  %v735_v61 = vld [vmem:[#allocation5 + $0x140] sm:$0xf]  ;;  %v756_v62 = vor.u32 %v873_v54, %v753_v55  ;;  %v837_v0 = vld [vmem:[#allocation5 + $0x44] sm:$0xf] }
  0x1a   :  { %438 = vmatpush.bf16.msra.mxu0 %v640_v44  ;;  %v871_v63 = vld [vmem:[#allocation5 + $0x14c] sm:$0xf0]  ;;  %v609_v1 = vld [vmem:[#allocation5 + $0x50] sm:$0xf0]  ;;  %v869_v2 = vld [vmem:[#allocation5 + $0x144] sm:$0xf]  ;;  %v608_v4 = vor.u32 %v839_v60, %v607_v59 }
  0x1b   :  { %451 = vmatpush.bf16.msra.mxu1 %v768_v45  ;;  %v737_v3 = vld [vmem:[#allocation5 + $0x150] sm:$0xf0]  ;;  %v736_v5 = vor.u32 %v871_v63, %v735_v61  ;;  %v612_v6 = vor.u32 %v837_v0, %v609_v1  ;;  %v591_v7 = vld [vmem:[#allocation5 + $0x20] sm:$0xf]  ;;  %v835_v8 = vld [vmem:[#allocation5 + $0x2c] sm:$0xf0] }
  0x1c   :  { %464 = vmatpush.bf16.msra.mxu2 %v644_v46  ;;  %v719_v9 = vld [vmem:[#allocation5 + $0x120] sm:$0xf]  ;;  %v740_v10 = vor.u32 %v869_v2, %v737_v3  ;;  %v867_v11 = vld [vmem:[#allocation5 + $0x12c] sm:$0xf0]  ;;  %v833_v12 = vld [vmem:[#allocation5 + $0x24] sm:$0xf]  ;;  %v592_v16 = vor.u32 %v835_v8, %v591_v7 }
  0x1d   :  { %477 = vmatpush.bf16.msra.mxu3 %v772_v50  ;;  %v593_v13 = vld [vmem:[#allocation5 + $0x30] sm:$0xf0]  ;;  %v865_v14 = vld [vmem:[#allocation5 + $0x124] sm:$0xf]  ;;  %v575_v17 = vld [vmem:[#allocation5] sm:$0xf]  ;;  %v720_v19 = vor.u32 %v867_v11, %v719_v9 }
  0x1e   :  { %439 = vmatpush.bf16.msra.mxu0 %v624_v56  ;;  %v721_v15 = vld [vmem:[#allocation5 + $0x130] sm:$0xf0]  ;;  %v831_v18 = vld [vmem:[#allocation5 + $0xc] sm:$0xf0]  ;;  %v596_v20 = vor.u32 %v833_v12, %v593_v13  ;;  %v703_v21 = vld [vmem:[#allocation5 + $0x100] sm:$0xf] }
  0x1f   :  { %452 = vmatpush.bf16.msra.mxu1 %v752_v57  ;;  %v863_v22 = vld [vmem:[#allocation5 + $0x10c] sm:$0xf0]  ;;  %v829_v23 = vld [vmem:[#allocation5 + $0x4] sm:$0xf]  ;;  %v724_v24 = vor.u32 %v865_v14, %v721_v15  ;;  %v577_v25 = vld [vmem:[#allocation5 + $0x10] sm:$0xf0]  ;;  %v576_v31 = vor.u32 %v831_v18, %v575_v17 }
  0x20   :  { %465 = vmatpush.bf16.msra.mxu2 %v628_v58  ;;  %v861_v26 = vld [vmem:[#allocation5 + $0x104] sm:$0xf]  ;;  %v705_v27 = vld [vmem:[#allocation5 + $0x110] sm:$0xf0]  ;;  %v695_v28 = vld [vmem:[#allocation5 + $0xe8] sm:$0xf]  ;;  %v704_v35 = vor.u32 %v863_v22, %v703_v21  ;;  %v580_v36 = vor.u32 %v829_v23, %v577_v25 }
  0x21   :  { %478 = vmatpush.bf16.msra.mxu3 %v756_v62  ;;  %v860_v29 = vld [vmem:[#allocation5 + $0xf4] sm:$0xf0]  ;;  %v823_v30 = vld [vmem:[#allocation5 + $0x1e8] sm:$0xf]  ;;  %v858_v33 = vld [vmem:[#allocation5 + $0xec] sm:$0xf]  ;;  %v708_v40 = vor.u32 %v861_v26, %v705_v27 }
  0x22   :  { %440 = vmatpush.bf16.msra.mxu0 %v608_v4  ;;  %v892_v32 = vld [vmem:[#allocation5 + $0x1f4] sm:$0xf0]  ;;  %v697_v34 = vld [vmem:[#allocation5 + $0xf8] sm:$0xf0]  ;;  %v890_v37 = vld [vmem:[#allocation5 + $0x1ec] sm:$0xf]  ;;  %v696_v41 = vor.u32 %v860_v29, %v695_v28 }
  0x23   :  { %453 = vmatpush.bf16.msra.mxu1 %v736_v5  ;;  %v825_v38 = vld [vmem:[#allocation5 + $0x1f8] sm:$0xf0]  ;;  %v42_v39 = vld [vmem:[#allocation2] sm:$0xff]  ;;  %v824_v43 = vor.u32 %v892_v32, %v823_v30  ;;  %v700_v44 = vor.u32 %v858_v33, %v697_v34  ;;  %v679_v45 = vld [vmem:[#allocation5 + $0xc8] sm:$0xf]  ;;  %s982_s0 = smov [#allocation7]  }
  0x24   :  { %466 = vmatpush.bf16.msra.mxu2 %v612_v6  ;;  %v43_v42 = vld [vmem:[#allocation2 + $0x8] sm:$0xff]  ;;  %v807_v47 = vld [vmem:[#allocation5 + $0x1c8] sm:$0xf]  ;;  %v828_v48 = vor.u32 %v890_v37, %v825_v38  ;;  %v854_v50 = vld [vmem:[#allocation5 + $0xcc] sm:$0xf]  ;;  %v1004_v52 = vpack.c.bf16 %v42_v39, %v42_v39  ;;  %v44_v62 = vmul.f32 %v42_v39, %v42_v39  ;;  %s560_s1 = sshll.u32 %s982_s0, 4  ;;  %s561_s1 = int_to_ptr.vmem [resolvable:$true] %s560_s1 }
  0x25   :  { %479 = vmatpush.bf16.msra.mxu3 %v740_v10  ;;  %v856_v46 = vld [vmem:[#allocation5 + $0xd4] sm:$0xf0]  ;;  %v681_v51 = vld [vmem:[#allocation5 + $0xd8] sm:$0xf0]  ;;  %v886_v53 = vld [vmem:[#allocation5 + $0x1cc] sm:$0xf]  ;;  %v1006_v55 = vpack.c.bf16 %v43_v42, %v43_v42  ;;  %v45_v3 = vmul.f32 %v43_v42, %v43_v42 }
  0x26   :  { %441 = vmatpush.bf16.msra.mxu0 %v592_v16  ;;  %v888_v49 = vld [vmem:[#allocation5 + $0x1d4] sm:$0xf0]  ;;  %v809_v54 = vld [vmem:[#allocation5 + $0x1d8] sm:$0xf0]  ;;  %v680_v56 = vor.u32 %v856_v46, %v679_v45  ;;  %v684_v58 = vor.u32 %v854_v50, %v681_v51  ;;  %v663_v59 = vld [vmem:[#allocation5 + $0xa8] sm:$0xf] }
  0x27   :  { %454 = vmatpush.bf16.msra.mxu1 %v720_v19  ;;  %v808_v57 = vor.u32 %v888_v49, %v807_v47  ;;  %v852_v60 = vld [vmem:[#allocation5 + $0xb4] sm:$0xf0]  ;;  %v791_v61 = vld [vmem:[#allocation5 + $0x1a8] sm:$0xf]  ;;  %v812_v63 = vor.u32 %v886_v53, %v809_v54  ;;  %v850_v1 = vld [vmem:[#allocation5 + $0xac] sm:$0xf]  ;;  %v46_v7 = vadd.f32 %v45_v3, %v44_v62 }
  0x28   :  { %467 = vmatpush.bf16.msra.mxu2 %v596_v20  ;;  %v884_v0 = vld [vmem:[#allocation5 + $0x1b4] sm:$0xf0]  ;;  %v665_v2 = vld [vmem:[#allocation5 + $0xb8] sm:$0xf0]  ;;  %v882_v4 = vld [vmem:[#allocation5 + $0x1ac] sm:$0xf]  ;;  %v664_v6 = vor.u32 %v852_v60, %v663_v59 }
  0x29   :  { %480 = vmatpush.bf16.msra.mxu3 %v724_v24  ;;  %v793_v5 = vld [vmem:[#allocation5 + $0x1b8] sm:$0xf0]  ;;  %v792_v8 = vor.u32 %v884_v0, %v791_v61  ;;  %v668_v9 = vor.u32 %v850_v1, %v665_v2  ;;  %v647_v10 = vld [vmem:[#allocation5 + $0x88] sm:$0xf]  ;;  %v848_v11 = vld [vmem:[#allocation5 + $0x94] sm:$0xf0]  ;;  %47 = vadd.xlane.f32.xlu0 %v46_v7 }
  0x2a   :  { %442 = vmatpush.bf16.msra.mxu0 %v576_v31  ;;  %v775_v12 = vld [vmem:[#allocation5 + $0x188] sm:$0xf]  ;;  %v796_v13 = vor.u32 %v882_v4, %v793_v5  ;;  %v880_v14 = vld [vmem:[#allocation5 + $0x194] sm:$0xf0]  ;;  %v846_v15 = vld [vmem:[#allocation5 + $0x8c] sm:$0xf]  ;;  %v648_v19 = vor.u32 %v848_v11, %v647_v10 }
  0x2b   :  { %455 = vmatpush.bf16.msra.mxu1 %v704_v35  ;;  %v649_v16 = vld [vmem:[#allocation5 + $0x98] sm:$0xf0]  ;;  %v878_v17 = vld [vmem:[#allocation5 + $0x18c] sm:$0xf]  ;;  %v776_v20 = vor.u32 %v880_v14, %v775_v12  ;;  %v631_v22 = vld [vmem:[#allocation5 + $0x68] sm:$0xf] }
  0x2c   :  { %468 = vmatpush.bf16.msra.mxu2 %v580_v36  ;;  %v777_v18 = vld [vmem:[#allocation5 + $0x198] sm:$0xf0]  ;;  %v652_v21 = vor.u32 %v846_v15, %v649_v16  ;;  %v844_v23 = vld [vmem:[#allocation5 + $0x74] sm:$0xf0]  ;;  %v759_v24 = vld [vmem:[#allocation5 + $0x168] sm:$0xf] }
  0x2d   :  { %481 = vmatpush.bf16.msra.mxu3 %v708_v40  ;;  %443 = vmatmul.bf16.vlgmr.msra.gmra.mxu0 %v1004_v52  ;;  %v780_v25 = vor.u32 %v878_v17, %v777_v18  ;;  %v876_v26 = vld [vmem:[#allocation5 + $0x174] sm:$0xf0]  ;;  %v842_v27 = vld [vmem:[#allocation5 + $0x6c] sm:$0xf]  ;;  %v633_v28 = vld [vmem:[#allocation5 + $0x78] sm:$0xf0]  ;;  %v632_v31 = vor.u32 %v844_v23, %v631_v22 }
  0x2e   :  { %487 = vmatpush.bf16.msrb.mxu0 %v696_v41  ;;  %456 = vmatmul.bf16.vlgmr.msra.gmra.mxu1 %v1006_v55  ;;  %v874_v29 = vld [vmem:[#allocation5 + $0x16c] sm:$0xf]  ;;  %v761_v30 = vld [vmem:[#allocation5 + $0x178] sm:$0xf0]  ;;  %v760_v32 = vor.u32 %v876_v26, %v759_v24  ;;  %v636_v33 = vor.u32 %v842_v27, %v633_v28  ;;  %v615_v34 = vld [vmem:[#allocation5 + $0x48] sm:$0xf] }
  0x2f   :  { %500 = vmatpush.bf16.msrb.mxu1 %v824_v43  ;;  %469 = vmatmul.bf16.vlgmr.msra.gmra.mxu2 %v1004_v52  ;;  %v840_v35 = vld [vmem:[#allocation5 + $0x54] sm:$0xf0]  ;;  %v743_v36 = vld [vmem:[#allocation5 + $0x148] sm:$0xf]  ;;  %v764_v37 = vor.u32 %v874_v29, %v761_v30  ;;  %v838_v39 = vld [vmem:[#allocation5 + $0x4c] sm:$0xf] }
  0x30   :  { %513 = vmatpush.bf16.msrb.mxu2 %v700_v44  ;;  %482 = vmatmul.bf16.vlgmr.msra.gmra.mxu3 %v1006_v55  ;;  %v872_v38 = vld [vmem:[#allocation5 + $0x154] sm:$0xf0]  ;;  %v617_v40 = vld [vmem:[#allocation5 + $0x58] sm:$0xf0]  ;;  %v870_v41 = vld [vmem:[#allocation5 + $0x14c] sm:$0xf]  ;;  %v616_v43 = vor.u32 %v840_v35, %v615_v34 }
  0x31   :  { %526 = vmatpush.bf16.msrb.mxu3 %v828_v48  ;;  %v745_v42 = vld [vmem:[#allocation5 + $0x158] sm:$0xf0]  ;;  %v744_v44 = vor.u32 %v872_v38, %v743_v36  ;;  %v620_v45 = vor.u32 %v838_v39, %v617_v40  ;;  %v599_v46 = vld [vmem:[#allocation5 + $0x28] sm:$0xf]  ;;  %v836_v47 = vld [vmem:[#allocation5 + $0x34] sm:$0xf0] }
  0x32   :  { %488 = vmatpush.bf16.msrb.mxu0 %v680_v56  ;;  %v727_v48 = vld [vmem:[#allocation5 + $0x128] sm:$0xf]  ;;  %v748_v49 = vor.u32 %v870_v41, %v745_v42  ;;  %v868_v50 = vld [vmem:[#allocation5 + $0x134] sm:$0xf0]  ;;  %v834_v51 = vld [vmem:[#allocation5 + $0x2c] sm:$0xf] }
  0x33   :  { %501 = vmatpush.bf16.msrb.mxu1 %v808_v57  ;;  %v601_v53 = vld [vmem:[#allocation5 + $0x38] sm:$0xf0]  ;;  %v866_v54 = vld [vmem:[#allocation5 + $0x12c] sm:$0xf]  ;;  %v600_v57 = vor.u32 %v836_v47, %v599_v46  ;;  %v583_v60 = vld [vmem:[#allocation5 + $0x8] sm:$0xf] }
  0x34   :  { %514 = vmatpush.bf16.msrb.mxu2 %v684_v58  ;;  %v729_v56 = vld [vmem:[#allocation5 + $0x138] sm:$0xf0]  ;;  %v728_v58 = vor.u32 %v868_v50, %v727_v48  ;;  %v604_v59 = vor.u32 %v834_v51, %v601_v53  ;;  %v832_v61 = vld [vmem:[#allocation5 + $0x14] sm:$0xf0]  ;;  %v711_v62 = vld [vmem:[#allocation5 + $0x108] sm:$0xf] }
  0x35   :  { %527 = vmatpush.bf16.msrb.mxu3 %v812_v63  ;;  %v732_v63 = vor.u32 %v866_v54, %v729_v56  ;;  %v864_v0 = vld [vmem:[#allocation5 + $0x114] sm:$0xf0]  ;;  %v830_v1 = vld [vmem:[#allocation5 + $0xc] sm:$0xf]  ;;  %v585_v2 = vld [vmem:[#allocation5 + $0x18] sm:$0xf0]  ;;  %v584_v5 = vor.u32 %v832_v61, %v583_v60 }
  0x36   :  { %489 = vmatpush.bf16.msrb.mxu0 %v664_v6  ;;  %v862_v3 = vld [vmem:[#allocation5 + $0x10c] sm:$0xf]  ;;  %v713_v4 = vld [vmem:[#allocation5 + $0x118] sm:$0xf0]  ;;  %v712_v6 = vor.u32 %v864_v0, %v711_v62  ;;  %v588_v7 = vor.u32 %v830_v1, %v585_v2  ;;  %s562_s23 = sshll.u32 %s1021_s2, 4  ;;  %s563_s23 = int_to_ptr.hbm [resolvable:$true] %s562_s23 }
  0x37   :  { %502 = vmatpush.bf16.msrb.mxu1 %v792_v8  ;;  %v716_v8 = vor.u32 %v862_v3, %v713_v4 }
  0x38   :  { %515 = vmatpush.bf16.msrb.mxu2 %v668_v9 }
  0x39   :  { %528 = vmatpush.bf16.msrb.mxu3 %v796_v13 }
  0x3a   :  { %490 = vmatpush.bf16.msrb.mxu0 %v648_v19 }
  0x3b   :  { %503 = vmatpush.bf16.msrb.mxu1 %v776_v20 }
  0x3c   :  { %516 = vmatpush.bf16.msrb.mxu2 %v652_v21 }
  0x3d   :  { %529 = vmatpush.bf16.msrb.mxu3 %v780_v25 }
  0x3e   :  { %491 = vmatpush.bf16.msrb.mxu0 %v632_v31 }
  0x3f   :  { %504 = vmatpush.bf16.msrb.mxu1 %v760_v32 }
  0x40   :  { %517 = vmatpush.bf16.msrb.mxu2 %v636_v33 }
  0x41   :  { %530 = vmatpush.bf16.msrb.mxu3 %v764_v37 }
  0x42   :  { %492 = vmatpush.bf16.msrb.mxu0 %v616_v43 }
  0x43   :  { %505 = vmatpush.bf16.msrb.mxu1 %v744_v44 }
  0x44   :  { %518 = vmatpush.bf16.msrb.mxu2 %v620_v45 }
  0x45   :  { %531 = vmatpush.bf16.msrb.mxu3 %v748_v49 }
  0x46   :  { %493 = vmatpush.bf16.msrb.mxu0 %v600_v57 }
  0x47   :  { %506 = vmatpush.bf16.msrb.mxu1 %v728_v58 }
  0x48   :  { %519 = vmatpush.bf16.msrb.mxu2 %v604_v59 }
  0x49   :  { %532 = vmatpush.bf16.msrb.mxu3 %v732_v63 }
  0x4a   :  { %494 = vmatpush.bf16.msrb.mxu0 %v584_v5 }
  0x4b   :  { %507 = vmatpush.bf16.msrb.mxu1 %v712_v6 }
  0x4c   :  { %520 = vmatpush.bf16.msrb.mxu2 %v588_v7 }
  0x4d   :  { %533 = vmatpush.bf16.msrb.mxu3 %v716_v8  ;;  %495 = vmatmul.bf16.vlgmr.msrb.gmra.mxu0 %v1004_v52 }
  0x4e   :  { %508 = vmatmul.bf16.vlgmr.msrb.gmra.mxu1 %v1006_v55 }
  0x4f   :  { %521 = vmatmul.bf16.vlgmr.msrb.gmra.mxu2 %v1004_v52 }
  0x50   :  { %534 = vmatmul.bf16.vlgmr.msrb.gmra.mxu3 %v1006_v55 }
  0x9c   :  { %v48_v17 = vpop.xlane.xlu0 %47 }
  0x9d   :  { %v545_v18 = vadd.f32 1e-12, %v48_v17 }
  0x9f   :  { %898 = vrcp.f32 %v545_v18 }
  0xa5   :  { %v899_v52 = vpop.eup %898 }
  0xaa   :  { %v444_v9 = vpop.f32.mrf.mxu0 }
  0xab   :  { %v457_v10 = vpop.f32.mrf.mxu1 }
  0xac   :  { %v458_v19 = vadd.f32 %v457_v10, %v444_v9 }
  0xae   :  { %v539_v23 = vmul.f32 %v458_v19, %v458_v19 }
  0xb2   :  { %v470_v11 = vpop.f32.mrf.mxu2  ;;  %v446_v13 = vpop.f32.mrf.mxu0 }
  0xb3   :  { %v483_v12 = vpop.f32.mrf.mxu3  ;;  %v459_v14 = vpop.f32.mrf.mxu1 }
  0xb4   :  { %v484_v55 = vadd.f32 %v483_v12, %v470_v11 }
  0xb6   :  { %v540_v33 = vmul.f32 %v484_v55, %v484_v55 }
  0xba   :  { %v472_v15 = vpop.f32.mrf.mxu2 }
  0xbb   :  { %v485_v16 = vpop.f32.mrf.mxu3 }
  0xca   :  { %v496_v20 = vpop.f32.mrf.mxu0 }
  0xcb   :  { %v509_v21 = vpop.f32.mrf.mxu1 }
  0xcc   :  { %v510_v22 = vadd.f32 %v509_v21, %v496_v20 }
  0xce   :  { %v541_v24 = vmul.f32 %v510_v22, %v510_v22 }
  0xd0   :  { %v543_v25 = vadd.f32 %v541_v24, %v539_v23 }
  0xd2   :  { %v522_v26 = vpop.f32.mrf.mxu2  ;;  %v547_v27 = vmul.f32 %v899_v52, %v543_v25  ;;  %v498_v29 = vpop.f32.mrf.mxu0 }
  0xd3   :  { %v535_v28 = vpop.f32.mrf.mxu3  ;;  %v511_v31 = vpop.f32.mrf.mxu1 }
  0xd4   :  { %v536_v30 = vadd.f32 %v535_v28, %v522_v26  ;;  %v549_v32 = vmax.f32 %v547_v27, 0.0 }
  0xd6   :  { %v542_v34 = vmul.f32 %v536_v30, %v536_v30  ;;  %v551_v35 = vmin.f32 %v549_v32, 1.0 }
  0xd8   :  { %v544_v36 = vadd.f32 %v542_v34, %v540_v33  ;;  %553 = vst [vmem:[#allocation7] sm:$0xff] %v551_v35 }
  0xda   :  { %v548_v37 = vmul.f32 %v899_v52, %v544_v36  ;;  %v524_v38 = vpop.f32.mrf.mxu2 }
  0xdb   :  { %v537_v39 = vpop.f32.mrf.mxu3 }
  0xdc   :  { %v550_v40 = vmax.f32 %v548_v37, 0.0 }
  0xde   :  { %v552_v41 = vmin.f32 %v550_v40, 1.0 }
  0xe0   :  { %554 = vst [vmem:[#allocation7 + $0x8] sm:$0xff] %v552_v41 }
  0xe1   :  { %565 = dma.vmem_to_hbm [thread:$0]  %s561_s1, 256, %s563_s23, [#allocation4]  }
  0xe2   :  { %976 = dma.done.wait [#allocation4], 256  }
  0xe3   :  { %977 = vsyncadd [#allocation4], 4294967040 }
  0xe4   :  { %570 = vsyncpa [#allocation3], 1 }
  0xe5   :  { %571 = vsyncpa [#allocation6], 1 }
  0xe6   :  { %572 = vsyncpa [#allocation4], 1 }

</bundles_post_ra>
